<compile_context>
chip_gen: v6e
topology: v6e:2x2x1
jax: 0.10.0
libtpu: 0.0.40
codegen_flags: <defaults>
</compile_context>

<pallas_src>
import numpy as np

import jax
import jax.numpy as jnp
from jax.experimental import pallas as pl
from jax.experimental.pallas import tpu as pltpu

EPS = 1e-6


def _gem_kernel_dynamic(p_ref, x_ref, pool_ref, o_ref):
    """Fused GeM pooling over all bin counts, runtime (learnable) exponent p.

    p_ref    : SMEM (1,)               learnable GeM exponent
    x_ref    : VMEM (TILE, HW)         lane-dense rows of the feature map
    pool_ref : VMEM (HW, TOTAL_PAD)    constant block-averaging matrix
    o_ref    : VMEM (TILE, TOTAL_PAD)
    """
    p = p_ref[0]
    inv_p = 1.0 / p

    x = jnp.maximum(x_ref[...].astype(jnp.float32), EPS)     # clamp(min=eps)
    # Per-row max shift from the raw clamped x: log is monotone so
    # log(max x) == max(log x); no full-size logx temporary is materialized.
    row_max = jnp.max(x, axis=-1, keepdims=True)              # XLU lane reduce
    row_log_max = jnp.log(row_max)                            # (TILE, 1) only
    # One fused elementwise pass: (x/xmax)**p = exp(p*(log x - log xmax)),
    # always in (0, 1] so no overflow; the shift cancels exactly below.
    xp = jnp.exp(p * (jnp.log(x) - row_log_max))

    # Segmented per-bin mean for all bin counts == one constant MXU matmul.
    pooled = jnp.dot(xp, pool_ref[...], preferred_element_type=jnp.float32)

    # mean**(1/p), undoing the row-max shift:  out = xmax * pooled**(1/p).
    out = jnp.exp(jnp.log(pooled) * inv_p + row_log_max)
    o_ref[...] = out.astype(o_ref.dtype)


def _make_gem_kernel_static(p):
    """Specialized kernel for a trace-time-known half-integer GeM exponent.

    x**p is computed with an exponentiation-by-squaring multiply chain plus a
    single sqrt — a handful of VPU multiplies + 1 EUP op per element instead of
    log + exp (2 EUP ops) — moving most transcendental work onto the 4-wide
    VALU slot which has slack.
    """
    two_p = int(round(2.0 * float(p)))
    assert two_p == 2.0 * float(p) and two_p > 0, "static_p must be half-integer"
    int_part, has_half = two_p // 2, bool(two_p % 2)
    inv_p = 1.0 / float(p)

    def kernel(x_ref, pool_ref, o_ref):
        x = jnp.maximum(x_ref[...].astype(jnp.float32), EPS)
        row_max = jnp.max(x, axis=-1, keepdims=True)
        xn = x * (1.0 / row_max)                              # in (0, 1]
        acc, base, e = None, xn, int_part
        while e:                                              # VPU multiply chain
            if e & 1:
                acc = base if acc is None else acc * base
            e >>= 1
            if e:
                base = base * base
        xp = acc if acc is not None else jnp.ones_like(xn)
        if has_half:
            xp = xp * jnp.sqrt(xn)                            # single EUP op
        pooled = jnp.dot(xp, pool_ref[...], preferred_element_type=jnp.float32)
        # Tiny epilogue on (TILE, TOTAL_PAD): mean**(1/p), undo the max shift.
        out = jnp.exp(jnp.log(pooled) * inv_p) * row_max
        o_ref[...] = out.astype(o_ref.dtype)

    return kernel


def _pooling_matrix(hw, bin_num, total_pad):
    """Constant [HW, total_pad] matrix: column j of bin b holds 1/m on its
    contiguous window of m = hw // b elements (matches x.view(n,c,b,-1)).
    Extra lane-padding columns hold a uniform 1/hw average (positive, so the
    in-kernel log never sees 0); they are sliced off in the wrapper."""
    cols = []
    for b in bin_num:
        m = hw // b
        cols.append(np.kron(np.eye(b, dtype=np.float32),
                            np.full((m, 1), 1.0 / m, dtype=np.float32)))
    mat = np.concatenate(cols, axis=1)
    total = mat.shape[1]
    if total_pad > total:
        pad = np.full((hw, total_pad - total), 1.0 / hw, dtype=np.float32)
        mat = np.concatenate([mat, pad], axis=1)
    return jnp.asarray(mat)


def _gemhpp_pallas(x, p_param, bin_num, static_p=None):
    n, c, h, w = x.shape
    hw, nc = h * w, n * c
    total = sum(bin_num)
    total_pad = ((total + 127) // 128) * 128          # lane-dense output width

    xr = x.reshape(nc, hw)

    itemsize = x.dtype.itemsize
    sublane = {4: 8, 2: 16, 1: 32}.get(itemsize, 8)   # min sublane tile per dtype

    # --- Row-tile sizing -----------------------------------------------------
    # Cap blocks at ~4 MiB of input (amortizes ~0.35us/step overhead, near the
    # HBM roofline on v5e/v6e, comfortably inside v7x VMEM).  Pick the NUMBER
    # of tiles first, then derive the tile size, so padding is minimal; keep
    # the grid even and >= 8 steps when there is enough work so v7x's two
    # TensorCores balance and double-buffering overlaps DMA with compute.
    target_block_bytes = 4 * 1024 * 1024
    bytes_per_row = hw * itemsize
    cap = max(sublane,
              min(1024, (target_block_bytes // bytes_per_row) // sublane * sublane))
    num_tiles = pl.cdiv(nc, cap)
    min_steps = 8
    if nc >= min_steps * sublane:
        num_tiles = max(num_tiles, min_steps)
    if num_tiles > 1 and num_tiles % 2:
        num_tiles += 1
    tile = max(sublane, pl.cdiv(pl.cdiv(nc, num_tiles), sublane) * sublane)
    num_tiles = pl.cdiv(nc, tile)
    nc_pad = num_tiles * tile
    if nc_pad != nc:
        # Harmless positive padding rows; sliced off after the call.
        xr = jnp.pad(xr, ((0, nc_pad - nc), (0, 0)), constant_values=1.0)

    pool = _pooling_matrix(hw, bin_num, total_pad)

    if static_p is None:
        transcendentals = nc_pad * (2 * hw + 2 * total_pad)   # log+exp per elem
    else:
        transcendentals = nc_pad * (hw + 2 * total_pad)       # sqrt per elem
    cost = pl.CostEstimate(
        flops=2 * nc_pad * hw * total_pad,                    # pooling matmul
        transcendentals=transcendentals,
        bytes_accessed=itemsize * nc_pad * hw + 4 * hw * total_pad
                       + itemsize * nc_pad * total_pad,
    )

    x_spec = pl.BlockSpec((tile, hw), lambda i: (i, 0))        # rows, lane-dense
    pool_spec = pl.BlockSpec((hw, total_pad), lambda i: (0, 0))  # resident constant
    out_spec = pl.BlockSpec((tile, total_pad), lambda i: (i, 0))

    common = dict(
        out_shape=jax.ShapeDtypeStruct((nc_pad, total_pad), x.dtype),
        compiler_params=pltpu.CompilerParams(
            dimension_semantics=("parallel",),                 # rows independent
            vmem_limit_bytes=32 * 1024 * 1024),
        cost_estimate=cost,
    )

    if static_p is None:
        out = pl.pallas_call(
            _gem_kernel_dynamic,
            grid_spec=pl.GridSpec(
                grid=(num_tiles,),
                in_specs=[pl.BlockSpec(memory_space=pltpu.MemorySpace.SMEM),  # p
                          x_spec, pool_spec],
                out_specs=out_spec),
            **common,
        )(p_param, xr, pool)
    else:
        out = pl.pallas_call(
            _make_gem_kernel_static(static_p),
            grid_spec=pl.GridSpec(
                grid=(num_tiles,),
                in_specs=[x_spec, pool_spec],
                out_specs=out_spec),
            **common,
        )(xr, pool)

    return out[:nc, :total].reshape(n, c, total)


def gemhpp_reference(x, p_param, bin_num=(64,)):
    """Pure-jnp reference mirroring the PyTorch module (naive formulation)."""
    n, c, h, w = x.shape
    p = p_param[0]
    feats = []
    for b in bin_num:
        z = jnp.maximum(x.reshape(n, c, b, -1), EPS)
        z = jnp.exp(p * jnp.log(z))            # z ** p   (z > 0)
        z = jnp.mean(z, axis=-1)
        z = jnp.exp(jnp.log(z) * (1.0 / p))    # z ** (1/p)
        feats.append(z)
    return jnp.concatenate(feats, axis=-1)


def gemhpp_forward(x, p_param, bin_num=(64,), use_pallas=None, static_p=None):
    """GeMHPP.forward. x: [n, c, h, w] -> [n, c, sum(bin_num)].

    static_p: optional trace-time-known value of the GeM exponent (must equal
    p_param and be half-integer); enables the multiply/sqrt fast path.
    """
    n, c, h, w = x.shape
    hw = h * w
    pallas_ok = (hw % 128 == 0) and all(hw % b == 0 for b in bin_num)
    if static_p is not None and float(static_p) * 2 != round(float(static_p) * 2):
        static_p = None                       # fall back to dynamic-p kernel
    if use_pallas is None:
        # Tiny problems: pallas_call launch overhead dwarfs the math; let XLA fuse.
        use_pallas = pallas_ok and (n * c * hw >= (1 << 16))
    if not (use_pallas and pallas_ok):
        return gemhpp_reference(x, p_param, bin_num)
    return _gemhpp_pallas(x, p_param, bin_num, static_p=static_p)


if __name__ == "__main__":
    # Deterministic parameter init (matches nn.Parameter(torch.ones(1) * 6.5)).
    p_param = jnp.ones((1,), dtype=jnp.float32) * 6.5
    bin_num = (64,)

    # Toy shape from the module: [n, c, h, w] = [2, 4, 16, 16] (hw=256 -> 64 bins
    # of 4).  This size would normally take the fused-XLA fallback; force the
    # Pallas path to exercise and validate the kernel.
    x_small = jax.random.normal(jax.random.PRNGKey(0), (2, 4, 16, 16), dtype=jnp.float32)
    ref = gemhpp_reference(x_small, p_param, bin_num)

    out = jax.block_until_ready(gemhpp_forward(x_small, p_param, bin_num, use_pallas=True))
    assert out.shape == (2, 4, sum(bin_num)), out.shape
    # Tolerances cover f32 transcendental rounding plus denormal-flush
    # differences between the max-shifted kernel and the naive reference in
    # near-all-clamped bins (bounded well below 1e-5 in absolute value).
    assert jnp.allclose(out, ref, rtol=2e-5, atol=1e-5), (
        float(jnp.max(jnp.abs(out - ref))))

    # Static-p fast path (multiply + sqrt chain instead of log/exp per element),
    # valid because p = 6.5 is half-integer and known at trace time.
    out_s = jax.block_until_ready(
        gemhpp_forward(x_small, p_param, bin_num, use_pallas=True, static_p=6.5))
    assert jnp.allclose(out_s, ref, rtol=2e-5, atol=1e-5), (
        float(jnp.max(jnp.abs(out_s - ref))))

    # A second case exercising the multi-step grid, minimal row padding and the
    # default size gate (nc = 1200 -> 8 tiles of 152 rows, only 16 padded rows,
    # even grid for v7x megacore balance).
    x_big = jax.random.normal(jax.random.PRNGKey(0), (2, 600, 16, 16), dtype=jnp.float32)
    out2 = jax.block_until_ready(gemhpp_forward(x_big, p_param, bin_num))
    ref2 = gemhpp_reference(x_big, p_param, bin_num)
    assert out2.shape == (2, 600, sum(bin_num)), out2.shape
    assert jnp.allclose(out2, ref2, rtol=2e-5, atol=1e-5), (
        float(jnp.max(jnp.abs(out2 - ref2))))

    print("KERNEL_OK")
</pallas_src>

<mosaic_0001>
module attributes {stable_mosaic.version = 11 : i64} {
  func.func @_gem_kernel_dynamic(%arg0: i32, %arg1: memref<1xf32, #tpu.memory_space<smem>>, %arg2: memref<8x256xf32, #tpu.memory_space<vmem>>, %arg3: memref<256x128xf32, #tpu.memory_space<vmem>>, %arg4: memref<8x128xf32, #tpu.memory_space<vmem>>) attributes {dimension_semantics = [#tpu.dimension_semantics<parallel>], iteration_bounds = array<i64: 1>, scalar_prefetch = 0 : i64, scratch_operands = 0 : i64, tpu.core_type = #tpu.core_type<tc>, window_params = [{transform_indices = @transform_0, window_bounds = array<i64: 1>}, {transform_indices = @transform_1, window_bounds = array<i64: 8, 256>}, {pipeline_mode = #tpu.pipeline_mode<synchronous>, transform_indices = @transform_2, window_bounds = array<i64: 256, 128>}, {transform_indices = @transform_3, window_bounds = array<i64: 8, 128>}]} {
    %c0 = arith.constant 0 : index
    %0 = memref.load %arg1[%c0] : memref<1xf32, #tpu.memory_space<smem>>
    %cst = arith.constant 1.000000e+00 : f32
    %1 = arith.divf %cst, %0 : f32
    %c0_0 = arith.constant 0 : index
    %c0_1 = arith.constant 0 : index
    %2 = vector.load %arg2[%c0_0, %c0_1] : memref<8x256xf32, #tpu.memory_space<vmem>>, vector<8x256xf32>
    %cst_2 = arith.constant 9.99999997E-7 : f32
    %3 = vector.broadcast %cst_2 : f32 to vector<8x256xf32>
    %4 = arith.maximumf %2, %3 : vector<8x256xf32>
    %cst_3 = arith.constant dense<0xFF800000> : vector<8xf32>
    %5 = vector.multi_reduction <maximumf>, %4, %cst_3 [1] : vector<8x256xf32> to vector<8xf32>
    %6 = vector.shape_cast %5 : vector<8xf32> to vector<8x1xf32>
    %7 = math.log %6 : vector<8x1xf32>
    %8 = math.log %4 : vector<8x256xf32>
    %9 = vector.broadcast %7 : vector<8x1xf32> to vector<8x256xf32>
    %10 = arith.subf %8, %9 : vector<8x256xf32>
    %11 = vector.broadcast %0 : f32 to vector<8x256xf32>
    %12 = arith.mulf %11, %10 : vector<8x256xf32>
    %13 = math.exp %12 : vector<8x256xf32>
    %c0_4 = arith.constant 0 : index
    %c0_5 = arith.constant 0 : index
    %14 = vector.load %arg3[%c0_4, %c0_5] : memref<256x128xf32, #tpu.memory_space<vmem>>, vector<256x128xf32>
    %cst_6 = arith.constant dense<0.000000e+00> : vector<8x128xf32>
    %15 = tpu.matmul %13, %14, %cst_6 {dimension_numbers = #tpu.dot_dimension_numbers<[1], [0], [0], [1], [0, 0, 1, 1], [], []>} : vector<8x256xf32>, vector<256x128xf32>, vector<8x128xf32> -> vector<8x128xf32>
    %16 = math.log %15 : vector<8x128xf32>
    %17 = vector.broadcast %1 : f32 to vector<8x128xf32>
    %18 = arith.mulf %16, %17 : vector<8x128xf32>
    %19 = vector.broadcast %7 : vector<8x1xf32> to vector<8x128xf32>
    %20 = arith.addf %18, %19 : vector<8x128xf32>
    %21 = math.exp %20 : vector<8x128xf32>
    %c0_7 = arith.constant 0 : index
    %c0_8 = arith.constant 0 : index
    %22 = vector.load %arg4[%c0_7, %c0_8] : memref<8x128xf32, #tpu.memory_space<vmem>>, vector<8x128xf32>
    tpu.vector_store %arg4[%c0_7, %c0_8], %21 {strides = array<i32>} : memref<8x128xf32, #tpu.memory_space<vmem>>, vector<8x128xf32>,
    return
  }
  func.func @transform_0(%arg0: i32) -> i32 {
    %c0_i32 = arith.constant 0 : i32
    %c0_i32_0 = arith.constant 0 : i32
    return %c0_i32 : i32
  }
  func.func @transform_1(%arg0: i32) -> (i32, i32) {
    %c0_i32 = arith.constant 0 : i32
    %c0_i32_0 = arith.constant 0 : i32
    return %arg0, %c0_i32 : i32, i32
  }
  func.func @transform_2(%arg0: i32) -> (i32, i32) {
    %c0_i32 = arith.constant 0 : i32
    %c0_i32_0 = arith.constant 0 : i32
    %c0_i32_1 = arith.constant 0 : i32
    return %c0_i32, %c0_i32_0 : i32, i32
  }
  func.func @transform_3(%arg0: i32) -> (i32, i32) {
    %c0_i32 = arith.constant 0 : i32
    %c0_i32_0 = arith.constant 0 : i32
    return %arg0, %c0_i32 : i32, i32
  }
}

</mosaic_0001>

<bundles_post_ra>
// kernel: tpu_custom_call.1
= control target key start
LH: loop header
LB: loop body
LE: loop exit
PB: predicated region body
PF: predicated region fallthrough
CT: control target
= control target key end

     0   :  { %9 = vsyncpa [#allocation4], 0  ;;  %s369_s0 = inlined_call_operand.<no memory space> [shape: f32[1], index: 0, kind: input, shape index: {}]   ;;  %s370_s1 = inlined_call_operand.hbm [shape: f32[8,256], index: 1, kind: input, shape index: {}]   ;;  %s371_s2 = inlined_call_operand.hbm [shape: f32[256,128], index: 2, kind: input, shape index: {}]   ;;  %s372_s3 = inlined_call_operand.hbm [shape: f32[8,128], index: 3, kind: output, shape index: {}]  }
   0x1   :  { %10 = vsyncpa [#allocation7], 0 }
   0x2   :  { %11 = vsyncpa [#allocation5], 0  ;;  %s318_s12 = smov [#allocation3]   ;;  %s319_s14 = smov [#allocation6]  }
   0x3   :  { %s20_s13 = sshll.u32 %s318_s12, 4  ;;  %s29_s15 = sshll.u32 %s319_s14, 4  ;;  %s21_s13 = int_to_ptr.vmem [resolvable:$true] %s20_s13  ;;  %s30_s15 = int_to_ptr.vmem [resolvable:$true] %s29_s15 }
   0x4   :  { %s260_s16 = scalar_lea.vmem %s21_s13, 256  ;;  %p265_p1 = scmp.lt.s32.totalorder %s21_s13, %s21_s13 }
   0x5   :  { %p261_p0 = scmp.ne.s32.totalorder %s21_s13, %s260_s16  ;;  %p266_p2 = scmp.lt.s32.totalorder %s260_s16, %s260_s16 }
   0x7   :  { %p267_p3 = por %p266_p2, %p265_p1 }
   0x9   :  { %p268_p4 = pnand %p267_p3, %p261_p0 }
   0xb   :  { %271 = shalt.err (!%p268_p4)
}
   0xc   :  { %23 = dma.hbm_to_vmem [thread:$0]  %s370_s1, 256, %s21_s13, [#allocation4]  }
   0xd   :  { %s280_s19 = scalar_lea.vmem %s30_s15, 4096  ;;  %p285_p6 = scmp.lt.s32.totalorder %s30_s15, %s30_s15 }
   0xe   :  { %p281_p5 = scmp.ne.s32.totalorder %s30_s15, %s280_s19  ;;  %p286_p7 = scmp.lt.s32.totalorder %s280_s19, %s280_s19 }
  0x10   :  { %p287_p8 = por %p286_p7, %p285_p6 }
  0x12   :  { %p288_p9 = pnand %p287_p8, %p281_p5 }
  0x14   :  { %291 = shalt.err (!%p288_p9)
}
  0x15   :  { %s320_s20 = smov 128   ;;  %s321_s21 = smov 8  }
  0x16   :  { %35 = dma.hbm_to_vmem [thread:$0]  %s371_s2, 4096, %s30_s15, [#allocation7], %s320_s20, %s320_s20, %s321_s21  }
  0x17   :  { %312 = dma.done.wait [#allocation4], 256  }
  0x18   :  { %313 = vsyncadd [#allocation4], 4294967040 }
  0x19   :  { %314 = dma.done.wait [#allocation7], 4096  }
  0x1a   :  { %315 = vsyncadd [#allocation7], 4294963200  ;;  %v349_v0 = vld [vmem:[#allocation3] sm:$0xff]  ;;  %v351_v1 = vld [vmem:[#allocation3 + $0x8] sm:$0xff]  ;;  %v43_v37 = vstv %s369_s0  ;;  %s322_s24 = smov [#allocation8]  }
  0x1b   :  { %v48_v2 = vmax.f32 %v349_v0, 1e-06  ;;  %v49_v3 = vmax.f32 %v351_v1, 1e-06  ;;  %v99_v5 = vld [vmem:[#allocation6 + $0xf8] sm:$0xff]  ;;  %v98_v7 = vld [vmem:[#allocation6 + $0xf0] sm:$0xff]  ;;  %236 = vrcp.f32 %v43_v37 }
  0x1c   :  { %194 = vmatprep.subr.mxu0 %v99_v5  ;;  %v83_v6 = vld [vmem:[#allocation6 + $0x78] sm:$0xff]  ;;  %v82_v8 = vld [vmem:[#allocation6 + $0x70] sm:$0xff]  ;;  %v97_v9 = vld [vmem:[#allocation6 + $0xe8] sm:$0xff]  ;;  %s184_s25 = sshll.u32 %s322_s24, 4  ;;  %s185_s25 = int_to_ptr.vmem [resolvable:$true] %s184_s25 }
  0x1d   :  { %v50_v4 = vmax.f32 %v48_v2, %v49_v3  ;;  %195 = vmatpush3.msra.mxu0 %v83_v6  ;;  %v81_v10 = vld [vmem:[#allocation6 + $0x68] sm:$0xff]  ;;  %v96_v11 = vld [vmem:[#allocation6 + $0xe0] sm:$0xff]  ;;  %v95_v13 = vld [vmem:[#allocation6 + $0xd8] sm:$0xff]  ;;  %238 = vlog2.f32 %v48_v2  ;;  %s292_s26 = scalar_lea.vmem %s185_s25, 128  ;;  %p297_p11 = scmp.lt.s32.totalorder %s185_s25, %s185_s25 }
  0x1e   :  { %196 = vmatprep.subr.mxu0 %v98_v7  ;;  %v80_v12 = vld [vmem:[#allocation6 + $0x60] sm:$0xff]  ;;  %v79_v14 = vld [vmem:[#allocation6 + $0x58] sm:$0xff]  ;;  %v94_v15 = vld [vmem:[#allocation6 + $0xd0] sm:$0xff]  ;;  %240 = vlog2.f32 %v49_v3  ;;  %p293_p10 = scmp.ne.s32.totalorder %s185_s25, %s292_s26  ;;  %p298_p12 = scmp.lt.s32.totalorder %s292_s26, %s292_s26 }
  0x1f   :  { %51 = vmax.xlane.f32.xlu0 %v50_v4  ;;  %197 = vmatpush3.msra.mxu0 %v82_v8  ;;  %v78_v16 = vld [vmem:[#allocation6 + $0x50] sm:$0xff]  ;;  %v93_v17 = vld [vmem:[#allocation6 + $0xc8] sm:$0xff]  ;;  %v92_v19 = vld [vmem:[#allocation6 + $0xc0] sm:$0xff] }
  0x20   :  { %198 = vmatprep.subr.mxu0 %v97_v9  ;;  %v77_v18 = vld [vmem:[#allocation6 + $0x48] sm:$0xff]  ;;  %v76_v20 = vld [vmem:[#allocation6 + $0x40] sm:$0xff]  ;;  %v91_v21 = vld [vmem:[#allocation6 + $0xb8] sm:$0xff]  ;;  %p299_p13 = por %p298_p12, %p297_p11 }
  0x21   :  { %199 = vmatpush3.msra.mxu0 %v81_v10  ;;  %v75_v22 = vld [vmem:[#allocation6 + $0x38] sm:$0xff]  ;;  %v90_v23 = vld [vmem:[#allocation6 + $0xb0] sm:$0xff]  ;;  %v89_v25 = vld [vmem:[#allocation6 + $0xa8] sm:$0xff] }
  0x22   :  { %200 = vmatprep.subr.mxu0 %v96_v11  ;;  %v74_v24 = vld [vmem:[#allocation6 + $0x30] sm:$0xff]  ;;  %v73_v26 = vld [vmem:[#allocation6 + $0x28] sm:$0xff]  ;;  %v88_v27 = vld [vmem:[#allocation6 + $0xa0] sm:$0xff]  ;;  %p300_p0 = pnand %p299_p13, %p293_p10 }
  0x23   :  { %201 = vmatpush3.msra.mxu0 %v80_v12  ;;  %v72_v28 = vld [vmem:[#allocation6 + $0x20] sm:$0xff]  ;;  %v87_v29 = vld [vmem:[#allocation6 + $0x98] sm:$0xff]  ;;  %v86_v31 = vld [vmem:[#allocation6 + $0x90] sm:$0xff] }
  0x24   :  { %202 = vmatprep.subr.mxu0 %v95_v13  ;;  %v71_v30 = vld [vmem:[#allocation6 + $0x18] sm:$0xff]  ;;  %v70_v32 = vld [vmem:[#allocation6 + $0x10] sm:$0xff]  ;;  %v85_v33 = vld [vmem:[#allocation6 + $0x88] sm:$0xff] }
  0x25   :  { %203 = vmatpush3.msra.mxu0 %v79_v14  ;;  %v69_v34 = vld [vmem:[#allocation6 + $0x8] sm:$0xff]  ;;  %v84_v35 = vld [vmem:[#allocation6 + $0x80] sm:$0xff] }
  0x26   :  { %204 = vmatprep.subr.mxu0 %v94_v15  ;;  %v68_v36 = vld [vmem:[#allocation6] sm:$0xff] }
  0x27   :  { %205 = vmatpush3.msra.mxu0 %v78_v16 }
  0x28   :  { %206 = vmatprep.subr.mxu0 %v93_v17  ;;  %v237_v38 = vpop.eup %236 }
  0x29   :  { %207 = vmatpush3.msra.mxu0 %v77_v18  ;;  %229 = vpush %v237_v38 }
  0x2a   :  { %208 = vmatprep.subr.mxu0 %v92_v19  ;;  %v239_v40 = vpop.eup %238 }
  0x2b   :  { %209 = vmatpush3.msra.mxu0 %v76_v20  ;;  %v241_v41 = vpop.eup %240  ;;  %v56_v42 = vmul.f32 0.6931472, %v239_v40 }
  0x2c   :  { %210 = vmatprep.subr.mxu0 %v91_v21  ;;  %v58_v43 = vmul.f32 0.6931472, %v241_v41 }
  0x2d   :  { %211 = vmatpush3.msra.mxu0 %v75_v22 }
  0x2e   :  { %212 = vmatprep.subr.mxu0 %v90_v23 }
  0x2f   :  { %213 = vmatpush3.msra.mxu0 %v74_v24 }
  0x30   :  { %214 = vmatprep.subr.mxu0 %v89_v25 }
  0x31   :  { %215 = vmatpush3.msra.mxu0 %v73_v26 }
  0x32   :  { %216 = vmatprep.subr.mxu0 %v88_v27 }
  0x33   :  { %217 = vmatpush3.msra.mxu0 %v72_v28 }
  0x34   :  { %218 = vmatprep.subr.mxu0 %v87_v29 }
  0x35   :  { %219 = vmatpush3.msra.mxu0 %v71_v30 }
  0x36   :  { %220 = vmatprep.subr.mxu0 %v86_v31 }
  0x37   :  { %221 = vmatpush3.msra.mxu0 %v70_v32 }
  0x38   :  { %222 = vmatprep.subr.mxu0 %v85_v33 }
  0x39   :  { %223 = vmatpush3.msra.mxu0 %v69_v34 }
  0x3a   :  { %224 = vmatprep.subr.mxu0 %v84_v35 }
  0x3b   :  { %225 = vmatpush3.msra.mxu0 %v68_v36 }
  0x5a   :  { %s230_s0 = spop %229 }
  0x5b   :  { %v172_v58 = vstv %s230_s0 }
  0xa8   :  { %v52_v39 = vpop.xlane.xlu0 %51 }
  0xa9   :  { %242 = vlog2.f32 %v52_v39 }
  0xb6   :  { %v243_v44 = vpop.eup %242 }
  0xb7   :  { %v54_v45 = vmul.f32 0.6931472, %v243_v44 }
  0xb9   :  { %v59_v46 = vsub.f32 %v56_v42, %v54_v45  ;;  %v60_v47 = vsub.f32 %v58_v43, %v54_v45 }
  0xbb   :  { %v62_v48 = vmul.f32 %v59_v46, %v43_v37  ;;  %v63_v49 = vmul.f32 %v60_v47, %v43_v37 }
  0xbd   :  { %v64_v50 = vmul.f32 1.442695, %v62_v48  ;;  %v66_v51 = vmul.f32 1.442695, %v63_v49 }
  0xbf   :  { %244 = vpow2.f32 %v64_v50 }
  0xc0   :  { %246 = vpow2.f32 %v66_v51 }
  0xcc   :  { %v245_v52 = vpop.eup %244 }
  0xcd   :  { %v247_v53 = vpop.eup %246 }
  0xce   :  { %164 = vmatprep.mubr.f32.mxu0 %v247_v53 }
  0xcf   :  { %165 = vmatmul.mubr.f32.vlgmr.msra.gmra.mxu0 %v245_v52 }
 0x18f   :  { %v226_v54 = vpop.f32.mrf.mxu0 }
 0x191   :  { %v227_v55 = vpop.f32.mrf.mxu0 }
 0x192   :  { %v228_v56 = vadd.f32 %v227_v55, %v226_v54 }
 0x194   :  { %248 = vlog2.f32 %v228_v56 }
 0x1a1   :  { %v249_v57 = vpop.eup %248 }
 0x1a2   :  { %v171_v59 = vmul.f32 0.6931472, %v249_v57 }
 0x1a4   :  { %v173_v60 = vmul.f32 %v172_v58, %v171_v59 }
 0x1a6   :  { %v174_v61 = vadd.f32 %v173_v60, %v54_v45 }
 0x1a8   :  { %v175_v62 = vmul.f32 1.442695, %v174_v61 }
 0x1aa   :  { %250 = vpow2.f32 %v175_v62 }
 0x1b7   :  { %v251_v63 = vpop.eup %250 }
 0x1b8   :  { %177 = vst [vmem:[#allocation8] sm:$0xff] %v251_v63 }
 0x1b9   :  { %303 = shalt.err (!%p300_p0)
}
 0x1ba   :  { %187 = dma.vmem_to_hbm [thread:$0]  %s185_s25, 128, %s372_s3, [#allocation5]  }
 0x1bb   :  { %316 = dma.done.wait [#allocation5], 128  }
 0x1bc   :  { %317 = vsyncadd [#allocation5], 4294967168 }
 0x1bd   :  { %191 = vsyncpa [#allocation4], 1 }
 0x1be   :  { %192 = vsyncpa [#allocation7], 1 }
 0x1bf   :  { %193 = vsyncpa [#allocation5], 1 }

</bundles_post_ra>
